<compile_context>
chip_gen: v6e
topology: v6e:2x2x1
jax: 0.10.0
libtpu: 0.0.40
codegen_flags: <defaults>
</compile_context>

<pallas_src>
import functools

import jax
import jax.numpy as jnp
from jax.experimental import pallas as pl
from jax.experimental.pallas import tpu as pltpu


def _round_up(x, m):
    return (x + m - 1) // m * m


def _make_rnn_kernel(L, Bp, T, H_pad):
    """Builds a Pallas kernel closed over the (static) layer count / shapes."""

    def kernel(x_ref, *args):
        # args layout:
        #   [wihT_0, whhT_0, b_0, ..., wihT_{L-1}, whhT_{L-1}, b_{L-1},
        #    wfcT, bfc,            (remaining inputs)
        #    out_ref]              (output, (Bp, O_pad) f32)
        layer_refs = args[: 3 * L]
        wfcT_ref, bfc_ref, out_ref = args[3 * L:]

        # Hoist all weight reads out of the unrolled recurrence.  The W_ih /
        # W_hh operands are loop-invariant, so the MXU RHS push is hoisted by
        # Mosaic instead of being re-issued every step (explicit
        # pltpu.matmul_push_rhs/_acc_lhs/_pop driving would be the next step
        # if a bundle dump ever showed per-step re-pushes).
        wihT = [layer_refs[3 * l][...] for l in range(L)]        # bf16
        whhT = [layer_refs[3 * l + 1][...] for l in range(L)]    # bf16
        bias = [layer_refs[3 * l + 2][...] for l in range(L)]    # (1, H_pad) f32
        # Hoisted per-layer bias broadcast (only needed for layers > 0; layer 0
        # adds its bias once to the hoisted projection below).
        bias_rows = [None] + [jnp.broadcast_to(bias[l], (Bp, H_pad))
                              for l in range(1, L)]

        x_all = x_ref[...]   # (T*Bp, D_in) bf16, time-major, batch padded to 8

        # Layer 0 input projection hoisted over ALL timesteps: one big MXU
        # matmul instead of T tiny ones inside the serial recurrence.
        pre0 = jnp.dot(x_all, wihT[0],
                       preferred_element_type=jnp.float32) + bias[0]

        # Wavefront over (layer, time), fully unrolled (T, L static & small).
        # h[l][t] is kept as a bf16 value (cast once) and consumed directly by
        # the next step's / next layer's / fc's MXU dots.
        h = [[None] * T for _ in range(L)]
        for w in range(T + L - 1):
            for l in range(L):
                t = w - l
                if t < 0 or t >= T:
                    continue
                if l == 0:
                    # sublane-aligned (8, H_pad) slice of the hoisted projection
                    pre_t = pre0[t * Bp:(t + 1) * Bp, :]
                else:
                    pre_t = (jnp.dot(h[l - 1][t], wihT[l],
                                     preferred_element_type=jnp.float32)
                             + bias_rows[l])
                if t == 0:
                    acc = pre_t                                   # h_{-1} = 0
                else:
                    acc = pre_t + jnp.dot(h[l][t - 1], whhT[l],
                                          preferred_element_type=jnp.float32)
                # f32 add/relu (v5e VPU has no bf16 path); cast to bf16 once
                # for reuse as an MXU operand.
                h[l][t] = jnp.maximum(acc, 0.0).astype(jnp.bfloat16)

        # fc on out[:, -1, :] == last hidden state of the last layer, fused
        # into the same straight-line trace; (Bp, O_pad) is a full unmasked
        # lane-dense store tile.
        out_ref[...] = (jnp.dot(h[L - 1][T - 1], wfcT_ref[...],
                                preferred_element_type=jnp.float32)
                        + bfc_ref[...])

    return kernel


def prepare_params(params, hidden_dim, layer_dim, output_dim):
    """One-time weight prep (pad to lane-dense 128, pre-transpose, cast bf16).

    Done OUTSIDE the jitted per-call forward so the per-call cost is just the
    kernel, not 3L+2 scatter/transpose/cast ops.
    """
    H, O = hidden_dim, output_dim
    H_pad = _round_up(max(H, 128), 128)
    O_pad = _round_up(max(O, 128), 128)
    prepped = []
    for l in range(layer_dim):
        w_ih, w_hh, b_ih, b_hh = params["layers"][l]
        d_l = w_ih.shape[1]
        d_pad = d_l if l == 0 else H_pad
        wihT = jnp.zeros((d_pad, H_pad), jnp.float32).at[:d_l, :H].set(
            jnp.asarray(w_ih, jnp.float32).T)
        whhT = jnp.zeros((H_pad, H_pad), jnp.float32).at[:H, :H].set(
            jnp.asarray(w_hh, jnp.float32).T)
        bias = jnp.zeros((1, H_pad), jnp.float32).at[0, :H].set(
            jnp.asarray(b_ih + b_hh, jnp.float32))
        prepped += [wihT.astype(jnp.bfloat16),      # (D_l or H_pad, H_pad)
                    whhT.astype(jnp.bfloat16),      # (H_pad, H_pad)
                    bias]                           # (1, H_pad) f32
    w_fc, b_fc = params["fc"]
    wfcT = jnp.zeros((H_pad, O_pad), jnp.float32).at[:H, :O].set(
        jnp.asarray(w_fc, jnp.float32).T)
    bfc = jnp.zeros((1, O_pad), jnp.float32).at[0, :O].set(
        jnp.asarray(b_fc, jnp.float32))
    prepped += [wfcT.astype(jnp.bfloat16), bfc]     # (H_pad, O_pad), (1, O_pad)
    return tuple(prepped), H_pad, O_pad


def rnn_model_forward(x_btd, prepped, *, layer_dim, output_dim, H_pad, O_pad):
    """x_btd: (B, T, D_in) float32, batch_first like the PyTorch module."""
    B, T, D = x_btd.shape
    Bp = _round_up(max(B, 8), 8)            # sublane-aligned batch tile

    # time-major, batch padded to Bp, flattened to (T*Bp, D_in); bf16 for MXU.
    x_tbd = jnp.transpose(x_btd, (1, 0, 2))
    if Bp != B:
        x_tbd = jnp.pad(x_tbd, ((0, 0), (0, Bp - B), (0, 0)))
    x_flat = x_tbd.reshape(T * Bp, D).astype(jnp.bfloat16)

    kernel = _make_rnn_kernel(layer_dim, Bp, T, H_pad)
    vmem = pl.BlockSpec(memory_space=pltpu.MemorySpace.VMEM)

    out_padded = pl.pallas_call(
        kernel,
        out_shape=jax.ShapeDtypeStruct((Bp, O_pad), jnp.float32),
        in_specs=[vmem] * (1 + len(prepped)),
        out_specs=vmem,
    )(x_flat, *prepped)

    return out_padded[:B, :output_dim]      # slice batch + lane padding off


def _reference_forward(x_btd, params, hidden_dim, layer_dim, output_dim):
    """Pure-JAX f32 reference matching torch.nn.RNN(batch_first, relu) + Linear."""
    B, T, _ = x_btd.shape
    seq = x_btd
    h_last = None
    for l in range(layer_dim):
        w_ih, w_hh, b_ih, b_hh = params["layers"][l]
        h = jnp.zeros((B, hidden_dim), jnp.float32)
        outs = []
        for t in range(T):
            h = jax.nn.relu(seq[:, t, :] @ w_ih.T + b_ih + h @ w_hh.T + b_hh)
            outs.append(h)
        seq = jnp.stack(outs, axis=1)
        h_last = h
    w_fc, b_fc = params["fc"]
    return h_last @ w_fc.T + b_fc


def init_params(key, input_dim, hidden_dim, layer_dim, output_dim):
    """Deterministic init mimicking PyTorch's U(-1/sqrt(H), 1/sqrt(H))."""
    params = {"layers": [], "fc": None}
    bound = 1.0 / jnp.sqrt(hidden_dim)
    for l in range(layer_dim):
        d_in = input_dim if l == 0 else hidden_dim
        key, k1, k2, k3, k4 = jax.random.split(key, 5)
        w_ih = jax.random.uniform(k1, (hidden_dim, d_in), jnp.float32, -bound, bound)
        w_hh = jax.random.uniform(k2, (hidden_dim, hidden_dim), jnp.float32, -bound, bound)
        b_ih = jax.random.uniform(k3, (hidden_dim,), jnp.float32, -bound, bound)
        b_hh = jax.random.uniform(k4, (hidden_dim,), jnp.float32, -bound, bound)
        params["layers"].append((w_ih, w_hh, b_ih, b_hh))
    key, k1, k2 = jax.random.split(key, 3)
    fc_bound = 1.0 / jnp.sqrt(hidden_dim)
    w_fc = jax.random.uniform(k1, (output_dim, hidden_dim), jnp.float32, -fc_bound, fc_bound)
    b_fc = jax.random.uniform(k2, (output_dim,), jnp.float32, -fc_bound, fc_bound)
    params["fc"] = (w_fc, b_fc)
    return params


if __name__ == "__main__":
    # Small shapes consistent with the module's forward (batch_first input).
    B, T = 2, 8
    INPUT_DIM = 16
    HIDDEN_DIM = 32
    LAYER_DIM = 2
    OUTPUT_DIM = 10

    key = jax.random.PRNGKey(0)
    key, kx = jax.random.split(key)
    x = jax.random.normal(kx, (B, T, INPUT_DIM), jnp.float32)

    params = init_params(key, INPUT_DIM, HIDDEN_DIM, LAYER_DIM, OUTPUT_DIM)

    # One-time parameter prep (padding / transpose / bf16) outside the jitted
    # per-call forward.
    prepped, H_pad, O_pad = prepare_params(params, HIDDEN_DIM, LAYER_DIM, OUTPUT_DIM)
    prepped = jax.block_until_ready(prepped)

    fwd = jax.jit(
        functools.partial(
            rnn_model_forward,
            layer_dim=LAYER_DIM,
            output_dim=OUTPUT_DIM,
            H_pad=H_pad,
            O_pad=O_pad,
        )
    )
    out = fwd(x, prepped)
    jax.block_until_ready(out)

    ref = _reference_forward(x, params, HIDDEN_DIM, LAYER_DIM, OUTPUT_DIM)
    assert out.shape == (B, OUTPUT_DIM)
    # bf16 matmul operands (f32 accumulation) over an 8-step recurrence: use a
    # bf16-appropriate tolerance against the f32 reference.  For much longer
    # sequences, keep the W_hh recurrence matmul in f32 (not the bottleneck).
    assert jnp.allclose(out, ref, rtol=3e-2, atol=3e-2), "Pallas output mismatch"

    print("KERNEL_OK")
</pallas_src>

<mosaic_0001>
module attributes {stable_mosaic.version = 11 : i64} {
  func.func @kernel(%arg0: memref<64x16xbf16, #tpu.memory_space<vmem>>, %arg1: memref<16x128xbf16, #tpu.memory_space<vmem>>, %arg2: memref<128x128xbf16, #tpu.memory_space<vmem>>, %arg3: memref<1x128xf32, #tpu.memory_space<vmem>>, %arg4: memref<128x128xbf16, #tpu.memory_space<vmem>>, %arg5: memref<128x128xbf16, #tpu.memory_space<vmem>>, %arg6: memref<1x128xf32, #tpu.memory_space<vmem>>, %arg7: memref<128x128xbf16, #tpu.memory_space<vmem>>, %arg8: memref<1x128xf32, #tpu.memory_space<vmem>>, %arg9: memref<8x128xf32, #tpu.memory_space<vmem>>) attributes {dimension_semantics = [], scalar_prefetch = 0 : i64, scratch_operands = 0 : i64, tpu.core_type = #tpu.core_type<tc>} {
    %c0 = arith.constant 0 : index
    %c0_0 = arith.constant 0 : index
    %0 = vector.load %arg1[%c0, %c0_0] : memref<16x128xbf16, #tpu.memory_space<vmem>>, vector<16x128xbf16>
    %c0_1 = arith.constant 0 : index
    %c0_2 = arith.constant 0 : index
    %1 = vector.load %arg4[%c0_1, %c0_2] : memref<128x128xbf16, #tpu.memory_space<vmem>>, vector<128x128xbf16>
    %c0_3 = arith.constant 0 : index
    %c0_4 = arith.constant 0 : index
    %2 = vector.load %arg2[%c0_3, %c0_4] : memref<128x128xbf16, #tpu.memory_space<vmem>>, vector<128x128xbf16>
    %c0_5 = arith.constant 0 : index
    %c0_6 = arith.constant 0 : index
    %3 = vector.load %arg5[%c0_5, %c0_6] : memref<128x128xbf16, #tpu.memory_space<vmem>>, vector<128x128xbf16>
    %c0_7 = arith.constant 0 : index
    %c0_8 = arith.constant 0 : index
    %4 = vector.load %arg3[%c0_7, %c0_8] : memref<1x128xf32, #tpu.memory_space<vmem>>, vector<1x128xf32>
    %c0_9 = arith.constant 0 : index
    %c0_10 = arith.constant 0 : index
    %5 = vector.load %arg6[%c0_9, %c0_10] : memref<1x128xf32, #tpu.memory_space<vmem>>, vector<1x128xf32>
    %6 = vector.shape_cast %5 : vector<1x128xf32> to vector<1x128xf32>
    %7 = vector.broadcast %6 : vector<1x128xf32> to vector<8x128xf32>
    %c0_11 = arith.constant 0 : index
    %c0_12 = arith.constant 0 : index
    %8 = vector.load %arg0[%c0_11, %c0_12] : memref<64x16xbf16, #tpu.memory_space<vmem>>, vector<64x16xbf16>
    %cst = arith.constant dense<0.000000e+00> : vector<64x128xf32>
    %9 = tpu.matmul %8, %0, %cst {dimension_numbers = #tpu.dot_dimension_numbers<[1], [0], [0], [1], [0, 0, 1, 1], [], []>} : vector<64x16xbf16>, vector<16x128xbf16>, vector<64x128xf32> -> vector<64x128xf32>
    %10 = vector.broadcast %4 : vector<1x128xf32> to vector<64x128xf32>
    %11 = arith.addf %9, %10 : vector<64x128xf32>
    %12 = vector.extract_strided_slice %11 {offsets = [0, 0], sizes = [8, 128], strides = [1, 1]} : vector<64x128xf32> to vector<8x128xf32>
    %cst_13 = arith.constant 0.000000e+00 : f32
    %13 = vector.broadcast %cst_13 : f32 to vector<8x128xf32>
    %14 = arith.maximumf %12, %13 : vector<8x128xf32>
    %15 = arith.truncf %14 : vector<8x128xf32> to vector<8x128xbf16>
    %16 = vector.extract_strided_slice %11 {offsets = [8, 0], sizes = [8, 128], strides = [1, 1]} : vector<64x128xf32> to vector<8x128xf32>
    %cst_14 = arith.constant dense<0.000000e+00> : vector<8x128xf32>
    %17 = tpu.matmul %15, %2, %cst_14 {dimension_numbers = #tpu.dot_dimension_numbers<[1], [0], [0], [1], [0, 0, 1, 1], [], []>} : vector<8x128xbf16>, vector<128x128xbf16>, vector<8x128xf32> -> vector<8x128xf32>
    %18 = arith.addf %16, %17 : vector<8x128xf32>
    %cst_15 = arith.constant 0.000000e+00 : f32
    %19 = vector.broadcast %cst_15 : f32 to vector<8x128xf32>
    %20 = arith.maximumf %18, %19 : vector<8x128xf32>
    %21 = arith.truncf %20 : vector<8x128xf32> to vector<8x128xbf16>
    %cst_16 = arith.constant dense<0.000000e+00> : vector<8x128xf32>
    %22 = tpu.matmul %15, %1, %cst_16 {dimension_numbers = #tpu.dot_dimension_numbers<[1], [0], [0], [1], [0, 0, 1, 1], [], []>} : vector<8x128xbf16>, vector<128x128xbf16>, vector<8x128xf32> -> vector<8x128xf32>
    %23 = arith.addf %22, %7 : vector<8x128xf32>
    %cst_17 = arith.constant 0.000000e+00 : f32
    %24 = vector.broadcast %cst_17 : f32 to vector<8x128xf32>
    %25 = arith.maximumf %23, %24 : vector<8x128xf32>
    %26 = arith.truncf %25 : vector<8x128xf32> to vector<8x128xbf16>
    %27 = vector.extract_strided_slice %11 {offsets = [16, 0], sizes = [8, 128], strides = [1, 1]} : vector<64x128xf32> to vector<8x128xf32>
    %cst_18 = arith.constant dense<0.000000e+00> : vector<8x128xf32>
    %28 = tpu.matmul %21, %2, %cst_18 {dimension_numbers = #tpu.dot_dimension_numbers<[1], [0], [0], [1], [0, 0, 1, 1], [], []>} : vector<8x128xbf16>, vector<128x128xbf16>, vector<8x128xf32> -> vector<8x128xf32>
    %29 = arith.addf %27, %28 : vector<8x128xf32>
    %cst_19 = arith.constant 0.000000e+00 : f32
    %30 = vector.broadcast %cst_19 : f32 to vector<8x128xf32>
    %31 = arith.maximumf %29, %30 : vector<8x128xf32>
    %32 = arith.truncf %31 : vector<8x128xf32> to vector<8x128xbf16>
    %cst_20 = arith.constant dense<0.000000e+00> : vector<8x128xf32>
    %33 = tpu.matmul %21, %1, %cst_20 {dimension_numbers = #tpu.dot_dimension_numbers<[1], [0], [0], [1], [0, 0, 1, 1], [], []>} : vector<8x128xbf16>, vector<128x128xbf16>, vector<8x128xf32> -> vector<8x128xf32>
    %34 = arith.addf %33, %7 : vector<8x128xf32>
    %cst_21 = arith.constant dense<0.000000e+00> : vector<8x128xf32>
    %35 = tpu.matmul %26, %3, %cst_21 {dimension_numbers = #tpu.dot_dimension_numbers<[1], [0], [0], [1], [0, 0, 1, 1], [], []>} : vector<8x128xbf16>, vector<128x128xbf16>, vector<8x128xf32> -> vector<8x128xf32>
    %36 = arith.addf %34, %35 : vector<8x128xf32>
    %cst_22 = arith.constant 0.000000e+00 : f32
    %37 = vector.broadcast %cst_22 : f32 to vector<8x128xf32>
    %38 = arith.maximumf %36, %37 : vector<8x128xf32>
    %39 = arith.truncf %38 : vector<8x128xf32> to vector<8x128xbf16>
    %40 = vector.extract_strided_slice %11 {offsets = [24, 0], sizes = [8, 128], strides = [1, 1]} : vector<64x128xf32> to vector<8x128xf32>
    %cst_23 = arith.constant dense<0.000000e+00> : vector<8x128xf32>
    %41 = tpu.matmul %32, %2, %cst_23 {dimension_numbers = #tpu.dot_dimension_numbers<[1], [0], [0], [1], [0, 0, 1, 1], [], []>} : vector<8x128xbf16>, vector<128x128xbf16>, vector<8x128xf32> -> vector<8x128xf32>
    %42 = arith.addf %40, %41 : vector<8x128xf32>
    %cst_24 = arith.constant 0.000000e+00 : f32
    %43 = vector.broadcast %cst_24 : f32 to vector<8x128xf32>
    %44 = arith.maximumf %42, %43 : vector<8x128xf32>
    %45 = arith.truncf %44 : vector<8x128xf32> to vector<8x128xbf16>
    %cst_25 = arith.constant dense<0.000000e+00> : vector<8x128xf32>
    %46 = tpu.matmul %32, %1, %cst_25 {dimension_numbers = #tpu.dot_dimension_numbers<[1], [0], [0], [1], [0, 0, 1, 1], [], []>} : vector<8x128xbf16>, vector<128x128xbf16>, vector<8x128xf32> -> vector<8x128xf32>
    %47 = arith.addf %46, %7 : vector<8x128xf32>
    %cst_26 = arith.constant dense<0.000000e+00> : vector<8x128xf32>
    %48 = tpu.matmul %39, %3, %cst_26 {dimension_numbers = #tpu.dot_dimension_numbers<[1], [0], [0], [1], [0, 0, 1, 1], [], []>} : vector<8x128xbf16>, vector<128x128xbf16>, vector<8x128xf32> -> vector<8x128xf32>
    %49 = arith.addf %47, %48 : vector<8x128xf32>
    %cst_27 = arith.constant 0.000000e+00 : f32
    %50 = vector.broadcast %cst_27 : f32 to vector<8x128xf32>
    %51 = arith.maximumf %49, %50 : vector<8x128xf32>
    %52 = arith.truncf %51 : vector<8x128xf32> to vector<8x128xbf16>
    %53 = vector.extract_strided_slice %11 {offsets = [32, 0], sizes = [8, 128], strides = [1, 1]} : vector<64x128xf32> to vector<8x128xf32>
    %cst_28 = arith.constant dense<0.000000e+00> : vector<8x128xf32>
    %54 = tpu.matmul %45, %2, %cst_28 {dimension_numbers = #tpu.dot_dimension_numbers<[1], [0], [0], [1], [0, 0, 1, 1], [], []>} : vector<8x128xbf16>, vector<128x128xbf16>, vector<8x128xf32> -> vector<8x128xf32>
    %55 = arith.addf %53, %54 : vector<8x128xf32>
    %cst_29 = arith.constant 0.000000e+00 : f32
    %56 = vector.broadcast %cst_29 : f32 to vector<8x128xf32>
    %57 = arith.maximumf %55, %56 : vector<8x128xf32>
    %58 = arith.truncf %57 : vector<8x128xf32> to vector<8x128xbf16>
    %cst_30 = arith.constant dense<0.000000e+00> : vector<8x128xf32>
    %59 = tpu.matmul %45, %1, %cst_30 {dimension_numbers = #tpu.dot_dimension_numbers<[1], [0], [0], [1], [0, 0, 1, 1], [], []>} : vector<8x128xbf16>, vector<128x128xbf16>, vector<8x128xf32> -> vector<8x128xf32>
    %60 = arith.addf %59, %7 : vector<8x128xf32>
    %cst_31 = arith.constant dense<0.000000e+00> : vector<8x128xf32>
    %61 = tpu.matmul %52, %3, %cst_31 {dimension_numbers = #tpu.dot_dimension_numbers<[1], [0], [0], [1], [0, 0, 1, 1], [], []>} : vector<8x128xbf16>, vector<128x128xbf16>, vector<8x128xf32> -> vector<8x128xf32>
    %62 = arith.addf %60, %61 : vector<8x128xf32>
    %cst_32 = arith.constant 0.000000e+00 : f32
    %63 = vector.broadcast %cst_32 : f32 to vector<8x128xf32>
    %64 = arith.maximumf %62, %63 : vector<8x128xf32>
    %65 = arith.truncf %64 : vector<8x128xf32> to vector<8x128xbf16>
    %66 = vector.extract_strided_slice %11 {offsets = [40, 0], sizes = [8, 128], strides = [1, 1]} : vector<64x128xf32> to vector<8x128xf32>
    %cst_33 = arith.constant dense<0.000000e+00> : vector<8x128xf32>
    %67 = tpu.matmul %58, %2, %cst_33 {dimension_numbers = #tpu.dot_dimension_numbers<[1], [0], [0], [1], [0, 0, 1, 1], [], []>} : vector<8x128xbf16>, vector<128x128xbf16>, vector<8x128xf32> -> vector<8x128xf32>
    %68 = arith.addf %66, %67 : vector<8x128xf32>
    %cst_34 = arith.constant 0.000000e+00 : f32
    %69 = vector.broadcast %cst_34 : f32 to vector<8x128xf32>
    %70 = arith.maximumf %68, %69 : vector<8x128xf32>
    %71 = arith.truncf %70 : vector<8x128xf32> to vector<8x128xbf16>
    %cst_35 = arith.constant dense<0.000000e+00> : vector<8x128xf32>
    %72 = tpu.matmul %58, %1, %cst_35 {dimension_numbers = #tpu.dot_dimension_numbers<[1], [0], [0], [1], [0, 0, 1, 1], [], []>} : vector<8x128xbf16>, vector<128x128xbf16>, vector<8x128xf32> -> vector<8x128xf32>
    %73 = arith.addf %72, %7 : vector<8x128xf32>
    %cst_36 = arith.constant dense<0.000000e+00> : vector<8x128xf32>
    %74 = tpu.matmul %65, %3, %cst_36 {dimension_numbers = #tpu.dot_dimension_numbers<[1], [0], [0], [1], [0, 0, 1, 1], [], []>} : vector<8x128xbf16>, vector<128x128xbf16>, vector<8x128xf32> -> vector<8x128xf32>
    %75 = arith.addf %73, %74 : vector<8x128xf32>
    %cst_37 = arith.constant 0.000000e+00 : f32
    %76 = vector.broadcast %cst_37 : f32 to vector<8x128xf32>
    %77 = arith.maximumf %75, %76 : vector<8x128xf32>
    %78 = arith.truncf %77 : vector<8x128xf32> to vector<8x128xbf16>
    %79 = vector.extract_strided_slice %11 {offsets = [48, 0], sizes = [8, 128], strides = [1, 1]} : vector<64x128xf32> to vector<8x128xf32>
    %cst_38 = arith.constant dense<0.000000e+00> : vector<8x128xf32>
    %80 = tpu.matmul %71, %2, %cst_38 {dimension_numbers = #tpu.dot_dimension_numbers<[1], [0], [0], [1], [0, 0, 1, 1], [], []>} : vector<8x128xbf16>, vector<128x128xbf16>, vector<8x128xf32> -> vector<8x128xf32>
    %81 = arith.addf %79, %80 : vector<8x128xf32>
    %cst_39 = arith.constant 0.000000e+00 : f32
    %82 = vector.broadcast %cst_39 : f32 to vector<8x128xf32>
    %83 = arith.maximumf %81, %82 : vector<8x128xf32>
    %84 = arith.truncf %83 : vector<8x128xf32> to vector<8x128xbf16>
    %cst_40 = arith.constant dense<0.000000e+00> : vector<8x128xf32>
    %85 = tpu.matmul %71, %1, %cst_40 {dimension_numbers = #tpu.dot_dimension_numbers<[1], [0], [0], [1], [0, 0, 1, 1], [], []>} : vector<8x128xbf16>, vector<128x128xbf16>, vector<8x128xf32> -> vector<8x128xf32>
    %86 = arith.addf %85, %7 : vector<8x128xf32>
    %cst_41 = arith.constant dense<0.000000e+00> : vector<8x128xf32>
    %87 = tpu.matmul %78, %3, %cst_41 {dimension_numbers = #tpu.dot_dimension_numbers<[1], [0], [0], [1], [0, 0, 1, 1], [], []>} : vector<8x128xbf16>, vector<128x128xbf16>, vector<8x128xf32> -> vector<8x128xf32>
    %88 = arith.addf %86, %87 : vector<8x128xf32>
    %cst_42 = arith.constant 0.000000e+00 : f32
    %89 = vector.broadcast %cst_42 : f32 to vector<8x128xf32>
    %90 = arith.maximumf %88, %89 : vector<8x128xf32>
    %91 = arith.truncf %90 : vector<8x128xf32> to vector<8x128xbf16>
    %92 = vector.extract_strided_slice %11 {offsets = [56, 0], sizes = [8, 128], strides = [1, 1]} : vector<64x128xf32> to vector<8x128xf32>
    %cst_43 = arith.constant dense<0.000000e+00> : vector<8x128xf32>
    %93 = tpu.matmul %84, %2, %cst_43 {dimension_numbers = #tpu.dot_dimension_numbers<[1], [0], [0], [1], [0, 0, 1, 1], [], []>} : vector<8x128xbf16>, vector<128x128xbf16>, vector<8x128xf32> -> vector<8x128xf32>
    %94 = arith.addf %92, %93 : vector<8x128xf32>
    %cst_44 = arith.constant 0.000000e+00 : f32
    %95 = vector.broadcast %cst_44 : f32 to vector<8x128xf32>
    %96 = arith.maximumf %94, %95 : vector<8x128xf32>
    %97 = arith.truncf %96 : vector<8x128xf32> to vector<8x128xbf16>
    %cst_45 = arith.constant dense<0.000000e+00> : vector<8x128xf32>
    %98 = tpu.matmul %84, %1, %cst_45 {dimension_numbers = #tpu.dot_dimension_numbers<[1], [0], [0], [1], [0, 0, 1, 1], [], []>} : vector<8x128xbf16>, vector<128x128xbf16>, vector<8x128xf32> -> vector<8x128xf32>
    %99 = arith.addf %98, %7 : vector<8x128xf32>
    %cst_46 = arith.constant dense<0.000000e+00> : vector<8x128xf32>
    %100 = tpu.matmul %91, %3, %cst_46 {dimension_numbers = #tpu.dot_dimension_numbers<[1], [0], [0], [1], [0, 0, 1, 1], [], []>} : vector<8x128xbf16>, vector<128x128xbf16>, vector<8x128xf32> -> vector<8x128xf32>
    %101 = arith.addf %99, %100 : vector<8x128xf32>
    %cst_47 = arith.constant 0.000000e+00 : f32
    %102 = vector.broadcast %cst_47 : f32 to vector<8x128xf32>
    %103 = arith.maximumf %101, %102 : vector<8x128xf32>
    %104 = arith.truncf %103 : vector<8x128xf32> to vector<8x128xbf16>
    %cst_48 = arith.constant dense<0.000000e+00> : vector<8x128xf32>
    %105 = tpu.matmul %97, %1, %cst_48 {dimension_numbers = #tpu.dot_dimension_numbers<[1], [0], [0], [1], [0, 0, 1, 1], [], []>} : vector<8x128xbf16>, vector<128x128xbf16>, vector<8x128xf32> -> vector<8x128xf32>
    %106 = arith.addf %105, %7 : vector<8x128xf32>
    %cst_49 = arith.constant dense<0.000000e+00> : vector<8x128xf32>
    %107 = tpu.matmul %104, %3, %cst_49 {dimension_numbers = #tpu.dot_dimension_numbers<[1], [0], [0], [1], [0, 0, 1, 1], [], []>} : vector<8x128xbf16>, vector<128x128xbf16>, vector<8x128xf32> -> vector<8x128xf32>
    %108 = arith.addf %106, %107 : vector<8x128xf32>
    %cst_50 = arith.constant 0.000000e+00 : f32
    %109 = vector.broadcast %cst_50 : f32 to vector<8x128xf32>
    %110 = arith.maximumf %108, %109 : vector<8x128xf32>
    %111 = arith.truncf %110 : vector<8x128xf32> to vector<8x128xbf16>
    %c0_51 = arith.constant 0 : index
    %c0_52 = arith.constant 0 : index
    %112 = vector.load %arg7[%c0_51, %c0_52] : memref<128x128xbf16, #tpu.memory_space<vmem>>, vector<128x128xbf16>
    %cst_53 = arith.constant dense<0.000000e+00> : vector<8x128xf32>
    %113 = tpu.matmul %111, %112, %cst_53 {dimension_numbers = #tpu.dot_dimension_numbers<[1], [0], [0], [1], [0, 0, 1, 1], [], []>} : vector<8x128xbf16>, vector<128x128xbf16>, vector<8x128xf32> -> vector<8x128xf32>
    %c0_54 = arith.constant 0 : index
    %c0_55 = arith.constant 0 : index
    %114 = vector.load %arg8[%c0_54, %c0_55] : memref<1x128xf32, #tpu.memory_space<vmem>>, vector<1x128xf32>
    %115 = vector.broadcast %114 : vector<1x128xf32> to vector<8x128xf32>
    %116 = arith.addf %113, %115 : vector<8x128xf32>
    %c0_56 = arith.constant 0 : index
    %c0_57 = arith.constant 0 : index
    %117 = vector.load %arg9[%c0_56, %c0_57] : memref<8x128xf32, #tpu.memory_space<vmem>>, vector<8x128xf32>
    tpu.vector_store %arg9[%c0_56, %c0_57], %116 {strides = array<i32>} : memref<8x128xf32, #tpu.memory_space<vmem>>, vector<8x128xf32>,
    return
  }
}

</mosaic_0001>

<bundles_post_ra>
// kernel: rnn_model_forward.1
= control target key start
LH: loop header
LB: loop body
LE: loop exit
PB: predicated region body
PF: predicated region fallthrough
CT: control target
= control target key end

     0   :  { %14 = vsyncpa [#allocation3], 0  ;;  %s2883_s0 = inlined_call_operand.vmem [shape: bf16[64,16], index: 0, kind: input, shape index: {}]   ;;  %s2884_s1 = inlined_call_operand.vmem [shape: bf16[16,128], index: 1, kind: input, shape index: {}]   ;;  %s2885_s2 = inlined_call_operand.vmem [shape: bf16[128,128], index: 2, kind: input, shape index: {}]   ;;  %s2886_s3 = inlined_call_operand.vmem [shape: f32[1,128], index: 3, kind: input, shape index: {}]   ;;  %s2887_s4 = inlined_call_operand.hbm [shape: bf16[128,128], index: 4, kind: input, shape index: {}]   ;;  %s2888_s5 = inlined_call_operand.hbm [shape: bf16[128,128], index: 5, kind: input, shape index: {}]   ;;  %s2889_s6 = inlined_call_operand.vmem [shape: f32[1,128], index: 6, kind: input, shape index: {}]   ;;  %s2890_s7 = inlined_call_operand.hbm [shape: bf16[128,128], index: 7, kind: input, shape index: {}]   ;;  %s2891_s8 = inlined_call_operand.vmem [shape: f32[1,128], index: 8, kind: input, shape index: {}]   ;;  %s2892_s9 = inlined_call_operand.vmem [shape: f32[8,128], index: 9, kind: output, shape index: {}]  }
   0x1   :  { %15 = vsyncpa [#allocation5], 0  ;;  %s2278_s30 = smov [#allocation4]   ;;  %s2279_s11 = smov [#allocation2]  }
   0x2   :  { %s41_s10 = sshll.u32 %s2278_s30, 4  ;;  %s29_s12 = sshll.u32 %s2279_s11, 4  ;;  %s42_s10 = int_to_ptr.vmem [resolvable:$true] %s41_s10  ;;  %s30_s12 = int_to_ptr.vmem [resolvable:$true] %s29_s12 }
   0x3   :  { %s2222_s13 = scalar_lea.vmem %s42_s10, 1024  ;;  %p2227_p1 = scmp.lt.s32.totalorder %s42_s10, %s42_s10 }
   0x4   :  { %p2223_p0 = scmp.ne.s32.totalorder %s42_s10, %s2222_s13  ;;  %p2228_p2 = scmp.lt.s32.totalorder %s2222_s13, %s2222_s13 }
   0x6   :  { %p2229_p3 = por %p2228_p2, %p2227_p1 }
   0x8   :  { %p2230_p4 = pnand %p2229_p3, %p2223_p0 }
   0xa   :  { %2233 = shalt.err (!%p2230_p4)
}
   0xb   :  { %s2280_s14 = smov 64   ;;  %s2281_s15 = smov 4  }
   0xc   :  { %47 = dma.hbm_to_vmem [thread:$0]  %s2888_s5, 1024, %s42_s10, [#allocation5], %s2280_s14, %s2280_s14, %s2281_s15  }
   0xd   :  { %s2242_s18 = scalar_lea.vmem %s30_s12, 1024  ;;  %p2247_p6 = scmp.lt.s32.totalorder %s30_s12, %s30_s12 }
   0xe   :  { %p2243_p5 = scmp.ne.s32.totalorder %s30_s12, %s2242_s18  ;;  %p2248_p7 = scmp.lt.s32.totalorder %s2242_s18, %s2242_s18 }
  0x10   :  { %p2249_p8 = por %p2248_p7, %p2247_p6 }
  0x12   :  { %p2250_p9 = pnand %p2249_p8, %p2243_p5 }
  0x14   :  { %2253 = shalt.err (!%p2250_p9)
}
  0x15   :  { %35 = dma.hbm_to_vmem [thread:$0]  %s2887_s4, 1024, %s30_s12, [#allocation3], %s2280_s14, %s2280_s14, %s2281_s15  }
  0x16   :  { %s2282_s21 = smov [#allocation6]  }
  0x17   :  { %s55_s22 = sshll.u32 %s2282_s21, 4  ;;  %s56_s22 = int_to_ptr.vmem [resolvable:$true] %s55_s22 }
  0x18   :  { %s2262_s23 = scalar_lea.vmem %s56_s22, 1024  ;;  %p2267_p11 = scmp.lt.s32.totalorder %s56_s22, %s56_s22 }
  0x19   :  { %p2263_p10 = scmp.ne.s32.totalorder %s56_s22, %s2262_s23  ;;  %p2268_p12 = scmp.lt.s32.totalorder %s2262_s23, %s2262_s23 }
  0x1b   :  { %p2269_p13 = por %p2268_p12, %p2267_p11 }
  0x1d   :  { %p2270_p0 = pnand %p2269_p13, %p2263_p10 }
  0x1f   :  { %2273 = shalt.err (!%p2270_p0)
}
  0x20   :  { %61 = dma.hbm_to_vmem [thread:$0]  %s2890_s7, 1024, %s56_s22, [#allocation5], %s2280_s14, %s2280_s14, %s2281_s15  }
  0x21   :  { %2274 = dma.done.wait [#allocation3], 1024  }
  0x22   :  { %2275 = vsyncadd [#allocation3], 4294966272 }
  0x23   :  { %2276 = dma.done.wait [#allocation5], 2048  }
  0x24   :  { %2277 = vsyncadd [#allocation5], 4294965248  ;;  %v2283_v0 = vmov 0.0   ;;  %v2171_v1 = vld [vmem:[%s2884_s1] sm:$0xff]   ;;  %vm172_vm0 = vcmask 130048   ;;  %v2173_v3 = vld [vmem:[%s2883_s0 + $0x8] sm:$0xff]  }
  0x25   :  { %1704 = vmatprep.subr.bf16.mxu1 %v2283_v0  ;;  %v2172_v2 = vld [vmem:[%s2883_s0] sm:$0xff]   ;;  %1694 = vmatprep.subr.bf16.mxu0 %v2171_v1  ;;  %v2358_v4 = vld [vmem:[%s2885_s2 + $0x38] sm:$0xff]   ;;  %v2367_v6 = vld [vmem:[%s2885_s2 + $0x30] sm:$0xff]   ;;  %vm2284_vm1 = vmmov 0  }
  0x26   :  { %1695 = vmatpush3.bf16.msra.mxu0 %v2171_v1  ;;  %1696 = vmatprep.mubr.msk.bf16.mxu0 %vm172_vm0, %v2172_v2  ;;  %v2361_v5 = vld [vmem:[#allocation2 + $0x38] sm:$0xff]   ;;  %v2372_v7 = vld [vmem:[#allocation2 + $0x30] sm:$0xff]   ;;  %v2379_v8 = vld [vmem:[%s2885_s2 + $0x28] sm:$0xff]  }
  0x27   :  { %1724 = vmatprep.subr.bf16.mxu0 %v2283_v0  ;;  %1705 = vmatpush3.bf16.msra.mxu1 %v2358_v4  ;;  %v2383_v9 = vld [vmem:[#allocation2 + $0x28] sm:$0xff]   ;;  %v2390_v10 = vld [vmem:[%s2885_s2 + $0x20] sm:$0xff]   ;;  %v2399_v12 = vld [vmem:[%s2885_s2 + $0x18] sm:$0xff]  }
  0x28   :  { %1706 = vmatprep.subr.bf16.mxu1 %v2283_v0  ;;  %v2393_v11 = vld [vmem:[#allocation2 + $0x20] sm:$0xff]   ;;  %v2403_v13 = vld [vmem:[#allocation2 + $0x18] sm:$0xff]   ;;  %v2410_v14 = vld [vmem:[%s2885_s2 + $0x10] sm:$0xff]   ;;  %1720 = vmatprep.mubr.msk.bf16.mxu1 %vm2284_vm1, %v2283_v0 }
  0x29   :  { %1697 = vmatmul.mubr.msk.bf16.vlgmr.msra.gmra.mxu0 %vm172_vm0, %v2173_v3  ;;  %v2414_v15 = vld [vmem:[#allocation2 + $0x10] sm:$0xff]   ;;  %v2187_v17 = vld [vmem:[%s2883_s0 + $0x18] sm:$0xff]   ;;  %v2433_v18 = vld [vmem:[%s2885_s2 + $0x8] sm:$0xff]  }
  0x2a   :  { %1725 = vmatpush3.bf16.msra.mxu0 %v2361_v5  ;;  %v2186_v16 = vld [vmem:[%s2883_s0 + $0x10] sm:$0xff]   ;;  %v2435_v19 = vld [vmem:[#allocation2 + $0x8] sm:$0xff]   ;;  %v2445_v20 = vld [vmem:[%s2885_s2] sm:$0xff]  }
  0x2b   :  { %1726 = vmatprep.subr.bf16.mxu0 %v2283_v0  ;;  %1707 = vmatpush3.bf16.msra.mxu1 %v2367_v6  ;;  %v2447_v21 = vld [vmem:[#allocation2] sm:$0xff]   ;;  %v2512_v43 = vld [vmem:[#allocation4 + $0x38] sm:$0xff]   ;;  %v2515_v47 = vld [vmem:[#allocation4 + $0x30] sm:$0xff]  }
  0x2c   :  { %1708 = vmatprep.subr.bf16.mxu1 %v2283_v0  ;;  %1700 = vmatprep.mubr.msk.bf16.mxu0 %vm172_vm0, %v2186_v16  ;;  %v2462_v23 = vld [vmem:[%s2886_s3] ss:$0 sm:$0xff]  ;;  %v2525_v48 = vld [vmem:[#allocation4 + $0x28] sm:$0xff]   ;;  %v2537_v50 = vld [vmem:[#allocation4 + $0x18] sm:$0xff]  }
  0x2d   :  { %v2531_v49 = vld [vmem:[#allocation4 + $0x20] sm:$0xff]   ;;  %v2543_v51 = vld [vmem:[#allocation4 + $0x10] sm:$0xff]   ;;  %v2554_v53 = vld [vmem:[#allocation4 + $0x8] sm:$0xff]  }
  0x2e   :  { %1727 = vmatpush3.bf16.msra.mxu0 %v2372_v7  ;;  %v2550_v52 = vld [vmem:[%s2889_s6] ss:$0 sm:$0xff] }
  0x2f   :  { %1728 = vmatprep.subr.bf16.mxu0 %v2283_v0  ;;  %1709 = vmatpush3.bf16.msra.mxu1 %v2379_v8  ;;  %v2561_v55 = vld [vmem:[#allocation4] sm:$0xff]  }
  0x30   :  { %1710 = vmatprep.subr.bf16.mxu1 %v2283_v0 }
  0x31   :  { %1701 = vmatmul.mubr.msk.bf16.gmra.mxu0 %vm172_vm0, %v2187_v17 }
  0x32   :  { %1729 = vmatpush3.bf16.msra.mxu0 %v2383_v9  ;;  %1740 = vmatprep.mubr.msk.bf16.mxu0 %vm2284_vm1, %v2283_v0 }
  0x33   :  { %1730 = vmatprep.subr.bf16.mxu0 %v2283_v0  ;;  %1711 = vmatpush3.bf16.msra.mxu1 %v2390_v10 }
  0x34   :  { %1712 = vmatprep.subr.bf16.mxu1 %v2283_v0 }
  0x36   :  { %1731 = vmatpush3.bf16.msra.mxu0 %v2393_v11 }
  0x37   :  { %1732 = vmatprep.subr.bf16.mxu0 %v2283_v0  ;;  %1713 = vmatpush3.bf16.msra.mxu1 %v2399_v12 }
  0x38   :  { %1714 = vmatprep.subr.bf16.mxu1 %v2283_v0 }
  0x3a   :  { %1733 = vmatpush3.bf16.msra.mxu0 %v2403_v13 }
  0x3b   :  { %1734 = vmatprep.subr.bf16.mxu0 %v2283_v0  ;;  %1715 = vmatpush3.bf16.msra.mxu1 %v2410_v14 }
  0x3c   :  { %1716 = vmatprep.subr.bf16.mxu1 %v2283_v0 }
  0x3e   :  { %1735 = vmatpush3.bf16.msra.mxu0 %v2414_v15 }
  0x3f   :  { %1736 = vmatprep.subr.bf16.mxu0 %v2283_v0  ;;  %1717 = vmatpush3.bf16.msra.mxu1 %v2433_v18 }
  0x40   :  { %1718 = vmatprep.subr.bf16.mxu1 %v2283_v0 }
  0x42   :  { %1737 = vmatpush3.bf16.msra.mxu0 %v2435_v19 }
  0x43   :  { %1738 = vmatprep.subr.bf16.mxu0 %v2283_v0  ;;  %1719 = vmatpush3.bf16.msra.mxu1 %v2445_v20 }
  0x44   :  { %1744 = vmatprep.subr.bf16.mxu1 %v2283_v0 }
  0x46   :  { %1739 = vmatpush3.bf16.msra.mxu0 %v2447_v21 }
  0x47   :  { %1764 = vmatprep.subr.bf16.mxu0 %v2283_v0 }
  0xe9   :  { %v2457_v22 = vpop.f32.mrf.mxu0 }
  0xea   :  { %v228_v58 = vadd.f32 %v2457_v22, %v2462_v23 }
  0xeb   :  { %v219_v24 = vpop.f32.mrf.mxu0 }
  0xec   :  { %v220_v25 = vadd.f32 %v2462_v23, %v219_v24 }
  0xed   :  { %v2501_v28 = vpop.f32.mrf.mxu0 }
  0xee   :  { %v250_v26 = vmax.f32 %v220_v25, 0.0 }
  0xef   :  { %v222_v29 = vpop.f32.mrf.mxu0 }
  0xf0   :  { %v251_v27 = vpack.c.bf16 %v250_v26, %v250_v26  ;;  %v223_v34 = vadd.f32 %v2462_v23, %v222_v29 }
  0xf1   :  { %v2503_v30 = vpop.f32.mrf.mxu0 }
  0xf2   :  { %1721 = vmatmul.mubr.bf16.vlgmr.msra.gmra.mxu1 %v251_v27  ;;  %1741 = vmatmul.mubr.bf16.vlgmr.msra.gmra.mxu0 %v251_v27 }
  0xf3   :  { %1745 = vmatpush3.bf16.msra.mxu1 %v2358_v4  ;;  %1765 = vmatpush3.bf16.msra.mxu0 %v2361_v5  ;;  %v2505_v31 = vpop.f32.mrf.mxu0 }
  0xf4   :  { %1746 = vmatprep.subr.bf16.mxu1 %v2283_v0  ;;  %1766 = vmatprep.subr.bf16.mxu0 %v2283_v0 }
  0xf5   :  { %1760 = vmatprep.mubr.msk.bf16.mxu1 %vm2284_vm1, %v2283_v0  ;;  %1780 = vmatprep.mubr.msk.bf16.mxu0 %vm2284_vm1, %v2283_v0  ;;  %v2507_v32 = vpop.f32.mrf.mxu0 }
  0xf7   :  { %1747 = vmatpush3.bf16.msra.mxu1 %v2367_v6  ;;  %1767 = vmatpush3.bf16.msra.mxu0 %v2372_v7  ;;  %v2509_v33 = vpop.f32.mrf.mxu0 }
  0xf8   :  { %1748 = vmatprep.subr.bf16.mxu1 %v2283_v0  ;;  %1768 = vmatprep.subr.bf16.mxu0 %v2283_v0 }
  0xfb   :  { %1749 = vmatpush3.bf16.msra.mxu1 %v2379_v8  ;;  %1769 = vmatpush3.bf16.msra.mxu0 %v2383_v9 }
  0xfc   :  { %1750 = vmatprep.subr.bf16.mxu1 %v2283_v0  ;;  %1770 = vmatprep.subr.bf16.mxu0 %v2283_v0 }
  0xff   :  { %1751 = vmatpush3.bf16.msra.mxu1 %v2390_v10  ;;  %1771 = vmatpush3.bf16.msra.mxu0 %v2393_v11 }
 0x100   :  { %1752 = vmatprep.subr.bf16.mxu1 %v2283_v0  ;;  %1772 = vmatprep.subr.bf16.mxu0 %v2283_v0 }
 0x103   :  { %1753 = vmatpush3.bf16.msra.mxu1 %v2399_v12  ;;  %1773 = vmatpush3.bf16.msra.mxu0 %v2403_v13 }
 0x104   :  { %1754 = vmatprep.subr.bf16.mxu1 %v2283_v0  ;;  %1774 = vmatprep.subr.bf16.mxu0 %v2283_v0 }
 0x107   :  { %1755 = vmatpush3.bf16.msra.mxu1 %v2410_v14  ;;  %1775 = vmatpush3.bf16.msra.mxu0 %v2414_v15 }
 0x108   :  { %1756 = vmatprep.subr.bf16.mxu1 %v2283_v0  ;;  %1776 = vmatprep.subr.bf16.mxu0 %v2283_v0 }
 0x10b   :  { %1757 = vmatpush3.bf16.msra.mxu1 %v2433_v18  ;;  %1777 = vmatpush3.bf16.msra.mxu0 %v2435_v19 }
 0x10c   :  { %1758 = vmatprep.subr.bf16.mxu1 %v2283_v0  ;;  %1778 = vmatprep.subr.bf16.mxu0 %v2283_v0 }
 0x10f   :  { %1759 = vmatpush3.bf16.msra.mxu1 %v2445_v20  ;;  %1779 = vmatpush3.bf16.msra.mxu0 %v2447_v21 }
 0x110   :  { %1784 = vmatprep.subr.bf16.mxu1 %v2283_v0  ;;  %1804 = vmatprep.subr.bf16.mxu0 %v2283_v0 }
 0x1b2   :  { %v334_v35 = vpop.f32.mrf.mxu1  ;;  %v425_v36 = vpop.f32.mrf.mxu0 }
 0x1b3   :  { %v340_v37 = vadd.f32 %v334_v35, %v223_v34  ;;  %v426_v54 = vadd.f32 %v2550_v52, %v425_v36 }
 0x1b4   :  { %v1722_v38 = vpop.f32.mrf.mxu1  ;;  %v1742_v39 = vpop.f32.mrf.mxu0 }
 0x1b5   :  { %v341_v40 = vmax.f32 %v340_v37, 0.0  ;;  %v431_v56 = vmax.f32 %v426_v54, 0.0  ;;  %v231_v37 = vadd.f32 %v2501_v28, %v2462_v23 }
 0x1b6   :  { %v337_v41 = vpop.f32.mrf.mxu1  ;;  %v428_v42 = vpop.f32.mrf.mxu0 }
 0x1b7   :  { %v342_v44 = vpack.c.bf16 %v341_v40, %v341_v40  ;;  %v432_v57 = vpack.c.bf16 %v431_v56, %v431_v56 }
 0x1b8   :  { %v1723_v45 = vpop.f32.mrf.mxu1  ;;  %v1743_v46 = vpop.f32.mrf.mxu0 }
 0x1b9   :  { %1761 = vmatmul.mubr.bf16.vlgmr.msra.gmra.mxu1 %v342_v44  ;;  %1781 = vmatmul.mubr.bf16.vlgmr.msra.gmra.mxu0 %v342_v44 }
 0x1ba   :  { %1785 = vmatpush3.bf16.msra.mxu1 %v2512_v43  ;;  %1800 = vmatprep.mubr.msk.bf16.mxu1 %vm2284_vm1, %v2283_v0 }
 0x1bb   :  { %1786 = vmatprep.subr.bf16.mxu1 %v2283_v0  ;;  %1805 = vmatpush3.bf16.msra.mxu0 %v2358_v4 }
 0x1bc   :  { %1806 = vmatprep.subr.bf16.mxu0 %v2283_v0  ;;  %1820 = vmatprep.mubr.msk.bf16.mxu0 %vm2284_vm1, %v2283_v0 }
 0x1be   :  { %1787 = vmatpush3.bf16.msra.mxu1 %v2515_v47 }
 0x1bf   :  { %1788 = vmatprep.subr.bf16.mxu1 %v2283_v0  ;;  %1807 = vmatpush3.bf16.msra.mxu0 %v2367_v6 }
 0x1c0   :  { %1808 = vmatprep.subr.bf16.mxu0 %v2283_v0 }
 0x1c2   :  { %1789 = vmatpush3.bf16.msra.mxu1 %v2525_v48 }
 0x1c3   :  { %1790 = vmatprep.subr.bf16.mxu1 %v2283_v0  ;;  %1809 = vmatpush3.bf16.msra.mxu0 %v2379_v8 }
 0x1c4   :  { %1810 = vmatprep.subr.bf16.mxu0 %v2283_v0 }
 0x1c6   :  { %1791 = vmatpush3.bf16.msra.mxu1 %v2531_v49 }
 0x1c7   :  { %1792 = vmatprep.subr.bf16.mxu1 %v2283_v0  ;;  %1811 = vmatpush3.bf16.msra.mxu0 %v2390_v10 }
 0x1c8   :  { %1812 = vmatprep.subr.bf16.mxu0 %v2283_v0 }
 0x1ca   :  { %1793 = vmatpush3.bf16.msra.mxu1 %v2537_v50 }
 0x1cb   :  { %1794 = vmatprep.subr.bf16.mxu1 %v2283_v0  ;;  %1813 = vmatpush3.bf16.msra.mxu0 %v2399_v12 }
 0x1cc   :  { %1814 = vmatprep.subr.bf16.mxu0 %v2283_v0 }
 0x1ce   :  { %1795 = vmatpush3.bf16.msra.mxu1 %v2543_v51 }
 0x1cf   :  { %1796 = vmatprep.subr.bf16.mxu1 %v2283_v0  ;;  %1815 = vmatpush3.bf16.msra.mxu0 %v2410_v14 }
 0x1d0   :  { %1816 = vmatprep.subr.bf16.mxu0 %v2283_v0 }
 0x1d2   :  { %1797 = vmatpush3.bf16.msra.mxu1 %v2554_v53 }
 0x1d3   :  { %1798 = vmatprep.subr.bf16.mxu1 %v2283_v0  ;;  %1817 = vmatpush3.bf16.msra.mxu0 %v2433_v18 }
 0x1d4   :  { %1818 = vmatprep.subr.bf16.mxu0 %v2283_v0 }
 0x1d6   :  { %1799 = vmatpush3.bf16.msra.mxu1 %v2561_v55 }
 0x1d7   :  { %1824 = vmatprep.subr.bf16.mxu1 %v2283_v0  ;;  %1819 = vmatpush3.bf16.msra.mxu0 %v2445_v20 }
 0x1d8   :  { %1844 = vmatprep.subr.bf16.mxu0 %v2283_v0 }
 0x1d9   :  { %1801 = vmatmul.mubr.bf16.vlgmr.msra.gmra.mxu1 %v432_v57 }
 0x1da   :  { %1825 = vmatpush3.bf16.msra.mxu1 %v2361_v5  ;;  %1840 = vmatprep.mubr.msk.bf16.mxu1 %vm2284_vm1, %v2283_v0 }
 0x1db   :  { %1826 = vmatprep.subr.bf16.mxu1 %v2283_v0 }
 0x1de   :  { %1827 = vmatpush3.bf16.msra.mxu1 %v2372_v7 }
 0x1df   :  { %1828 = vmatprep.subr.bf16.mxu1 %v2283_v0 }
 0x1e2   :  { %1829 = vmatpush3.bf16.msra.mxu1 %v2383_v9 }
 0x1e3   :  { %1830 = vmatprep.subr.bf16.mxu1 %v2283_v0 }
 0x1e6   :  { %1831 = vmatpush3.bf16.msra.mxu1 %v2393_v11 }
 0x1e7   :  { %1832 = vmatprep.subr.bf16.mxu1 %v2283_v0 }
 0x1ea   :  { %1833 = vmatpush3.bf16.msra.mxu1 %v2403_v13 }
 0x1eb   :  { %1834 = vmatprep.subr.bf16.mxu1 %v2283_v0 }
 0x1ee   :  { %1835 = vmatpush3.bf16.msra.mxu1 %v2414_v15 }
 0x1ef   :  { %1836 = vmatprep.subr.bf16.mxu1 %v2283_v0 }
 0x1f2   :  { %1837 = vmatpush3.bf16.msra.mxu1 %v2435_v19 }
 0x1f3   :  { %1838 = vmatprep.subr.bf16.mxu1 %v2283_v0 }
 0x1f6   :  { %1839 = vmatpush3.bf16.msra.mxu1 %v2447_v21 }
 0x1f7   :  { %1864 = vmatprep.subr.bf16.mxu1 %v2283_v0 }
 0x279   :  { %v467_v59 = vpop.f32.mrf.mxu1  ;;  %v510_v60 = vpop.f32.mrf.mxu0 }
 0x27a   :  { %v473_v61 = vadd.f32 %v467_v59, %v228_v58  ;;  %v511_v22 = vadd.f32 %v2550_v52, %v510_v60 }
 0x27b   :  { %v1762_v62 = vpop.f32.mrf.mxu1  ;;  %v1782_v63 = vpop.f32.mrf.mxu0 }
 0x27c   :  { %v474_v1 = vmax.f32 %v473_v61, 0.0 }
 0x27d   :  { %v470_v2 = vpop.f32.mrf.mxu1  ;;  %v513_v3 = vpop.f32.mrf.mxu0 }
 0x27e   :  { %v475_v16 = vpack.c.bf16 %v474_v1, %v474_v1  ;;  %v236_v2 = vadd.f32 %v2462_v23, %v2505_v31 }
 0x27f   :  { %v1763_v17 = vpop.f32.mrf.mxu1  ;;  %v1783_v24 = vpop.f32.mrf.mxu0 }
 0x280   :  { %1821 = vmatmul.mubr.bf16.vlgmr.msra.gmra.mxu0 %v475_v16  ;;  %1841 = vmatmul.mubr.bf16.vlgmr.msra.gmra.mxu1 %v475_v16 }
 0x281   :  { %1845 = vmatpush3.bf16.msra.mxu0 %v2512_v43  ;;  %1860 = vmatprep.mubr.msk.bf16.mxu0 %vm2284_vm1, %v2283_v0 }
 0x282   :  { %1846 = vmatprep.subr.bf16.mxu0 %v2283_v0  ;;  %1865 = vmatpush3.bf16.msra.mxu1 %v2358_v4 }
 0x283   :  { %1866 = vmatprep.subr.bf16.mxu1 %v2283_v0  ;;  %1880 = vmatprep.mubr.msk.bf16.mxu1 %vm2284_vm1, %v2283_v0 }
 0x285   :  { %1847 = vmatpush3.bf16.msra.mxu0 %v2515_v47 }
 0x286   :  { %1848 = vmatprep.subr.bf16.mxu0 %v2283_v0  ;;  %1867 = vmatpush3.bf16.msra.mxu1 %v2367_v6 }
 0x287   :  { %1868 = vmatprep.subr.bf16.mxu1 %v2283_v0 }
 0x289   :  { %1849 = vmatpush3.bf16.msra.mxu0 %v2525_v48 }
 0x28a   :  { %1850 = vmatprep.subr.bf16.mxu0 %v2283_v0  ;;  %1869 = vmatpush3.bf16.msra.mxu1 %v2379_v8 }
 0x28b   :  { %1870 = vmatprep.subr.bf16.mxu1 %v2283_v0 }
 0x28d   :  { %1851 = vmatpush3.bf16.msra.mxu0 %v2531_v49 }
 0x28e   :  { %1852 = vmatprep.subr.bf16.mxu0 %v2283_v0  ;;  %1871 = vmatpush3.bf16.msra.mxu1 %v2390_v10 }
 0x28f   :  { %1872 = vmatprep.subr.bf16.mxu1 %v2283_v0 }
 0x291   :  { %1853 = vmatpush3.bf16.msra.mxu0 %v2537_v50 }
 0x292   :  { %1854 = vmatprep.subr.bf16.mxu0 %v2283_v0  ;;  %1873 = vmatpush3.bf16.msra.mxu1 %v2399_v12 }
 0x293   :  { %1874 = vmatprep.subr.bf16.mxu1 %v2283_v0 }
 0x295   :  { %1855 = vmatpush3.bf16.msra.mxu0 %v2543_v51 }
 0x296   :  { %1856 = vmatprep.subr.bf16.mxu0 %v2283_v0  ;;  %1875 = vmatpush3.bf16.msra.mxu1 %v2410_v14 }
 0x297   :  { %1876 = vmatprep.subr.bf16.mxu1 %v2283_v0 }
 0x299   :  { %v598_v25 = vpop.f32.mrf.mxu1  ;;  %1857 = vmatpush3.bf16.msra.mxu0 %v2554_v53 }
 0x29a   :  { %v604_v26 = vadd.f32 %v598_v25, %v511_v22  ;;  %1858 = vmatprep.subr.bf16.mxu0 %v2283_v0  ;;  %1877 = vmatpush3.bf16.msra.mxu1 %v2433_v18 }
 0x29b   :  { %v1802_v27 = vpop.f32.mrf.mxu1  ;;  %1878 = vmatprep.subr.bf16.mxu1 %v2283_v0 }
 0x29c   :  { %v605_v29 = vmax.f32 %v604_v26, 0.0 }
 0x29d   :  { %v601_v34 = vpop.f32.mrf.mxu1  ;;  %1859 = vmatpush3.bf16.msra.mxu0 %v2561_v55 }
 0x29e   :  { %v606_v35 = vpack.c.bf16 %v605_v29, %v605_v29  ;;  %1884 = vmatprep.subr.bf16.mxu0 %v2283_v0  ;;  %1879 = vmatpush3.bf16.msra.mxu1 %v2445_v20 }
 0x29f   :  { %v1803_v36 = vpop.f32.mrf.mxu1  ;;  %1904 = vmatprep.subr.bf16.mxu1 %v2283_v0 }
 0x2a0   :  { %1861 = vmatmul.mubr.bf16.vlgmr.msra.gmra.mxu0 %v606_v35 }
 0x2a1   :  { %1885 = vmatpush3.bf16.msra.mxu0 %v2361_v5  ;;  %1900 = vmatprep.mubr.msk.bf16.mxu0 %vm2284_vm1, %v2283_v0 }
 0x2a2   :  { %1886 = vmatprep.subr.bf16.mxu0 %v2283_v0 }
 0x2a5   :  { %1887 = vmatpush3.bf16.msra.mxu0 %v2372_v7 }
 0x2a6   :  { %1888 = vmatprep.subr.bf16.mxu0 %v2283_v0 }
 0x2a9   :  { %1889 = vmatpush3.bf16.msra.mxu0 %v2383_v9 }
 0x2aa   :  { %1890 = vmatprep.subr.bf16.mxu0 %v2283_v0 }
 0x2ad   :  { %1891 = vmatpush3.bf16.msra.mxu0 %v2393_v11 }
 0x2ae   :  { %1892 = vmatprep.subr.bf16.mxu0 %v2283_v0 }
 0x2b1   :  { %1893 = vmatpush3.bf16.msra.mxu0 %v2403_v13 }
 0x2b2   :  { %1894 = vmatprep.subr.bf16.mxu0 %v2283_v0 }
 0x2b5   :  { %1895 = vmatpush3.bf16.msra.mxu0 %v2414_v15 }
 0x2b6   :  { %1896 = vmatprep.subr.bf16.mxu0 %v2283_v0 }
 0x2b9   :  { %1897 = vmatpush3.bf16.msra.mxu0 %v2435_v19 }
 0x2ba   :  { %1898 = vmatprep.subr.bf16.mxu0 %v2283_v0 }
 0x2bd   :  { %1899 = vmatpush3.bf16.msra.mxu0 %v2447_v21 }
 0x2be   :  { %1924 = vmatprep.subr.bf16.mxu0 %v2283_v0 }
 0x340   :  { %v641_v38 = vpop.f32.mrf.mxu0  ;;  %v684_v39 = vpop.f32.mrf.mxu1 }
 0x341   :  { %v647_v40 = vadd.f32 %v641_v38, %v231_v37  ;;  %v685_v28 = vadd.f32 %v2550_v52, %v684_v39 }
 0x342   :  { %v1822_v41 = vpop.f32.mrf.mxu0  ;;  %v1842_v42 = vpop.f32.mrf.mxu1 }
 0x343   :  { %v648_v44 = vmax.f32 %v647_v40, 0.0 }
 0x344   :  { %v644_v45 = vpop.f32.mrf.mxu0  ;;  %v687_v46 = vpop.f32.mrf.mxu1 }
 0x345   :  { %v649_v54 = vpack.c.bf16 %v648_v44, %v648_v44 }
 0x346   :  { %v1823_v56 = vpop.f32.mrf.mxu0  ;;  %v1843_v57 = vpop.f32.mrf.mxu1 }
 0x347   :  { %1881 = vmatmul.mubr.bf16.vlgmr.msra.gmra.mxu1 %v649_v54  ;;  %1901 = vmatmul.mubr.bf16.vlgmr.msra.gmra.mxu0 %v649_v54 }
 0x348   :  { %1905 = vmatpush3.bf16.msra.mxu1 %v2512_v43  ;;  %1920 = vmatprep.mubr.msk.bf16.mxu1 %vm2284_vm1, %v2283_v0 }
 0x349   :  { %1906 = vmatprep.subr.bf16.mxu1 %v2283_v0  ;;  %1925 = vmatpush3.bf16.msra.mxu0 %v2358_v4 }
 0x34a   :  { %1926 = vmatprep.subr.bf16.mxu0 %v2283_v0  ;;  %1940 = vmatprep.mubr.msk.bf16.mxu0 %vm2284_vm1, %v2283_v0 }
 0x34c   :  { %1907 = vmatpush3.bf16.msra.mxu1 %v2515_v47 }
 0x34d   :  { %1908 = vmatprep.subr.bf16.mxu1 %v2283_v0  ;;  %1927 = vmatpush3.bf16.msra.mxu0 %v2367_v6 }
 0x34e   :  { %1928 = vmatprep.subr.bf16.mxu0 %v2283_v0 }
 0x350   :  { %1909 = vmatpush3.bf16.msra.mxu1 %v2525_v48 }
 0x351   :  { %1910 = vmatprep.subr.bf16.mxu1 %v2283_v0  ;;  %1929 = vmatpush3.bf16.msra.mxu0 %v2379_v8 }
 0x352   :  { %1930 = vmatprep.subr.bf16.mxu0 %v2283_v0 }
 0x354   :  { %1911 = vmatpush3.bf16.msra.mxu1 %v2531_v49 }
 0x355   :  { %1912 = vmatprep.subr.bf16.mxu1 %v2283_v0  ;;  %1931 = vmatpush3.bf16.msra.mxu0 %v2390_v10 }
 0x356   :  { %1932 = vmatprep.subr.bf16.mxu0 %v2283_v0 }
 0x358   :  { %1913 = vmatpush3.bf16.msra.mxu1 %v2537_v50 }
 0x359   :  { %1914 = vmatprep.subr.bf16.mxu1 %v2283_v0  ;;  %1933 = vmatpush3.bf16.msra.mxu0 %v2399_v12 }
 0x35a   :  { %1934 = vmatprep.subr.bf16.mxu0 %v2283_v0 }
 0x35c   :  { %1915 = vmatpush3.bf16.msra.mxu1 %v2543_v51 }
 0x35d   :  { %1916 = vmatprep.subr.bf16.mxu1 %v2283_v0  ;;  %1935 = vmatpush3.bf16.msra.mxu0 %v2410_v14 }
 0x35e   :  { %1936 = vmatprep.subr.bf16.mxu0 %v2283_v0 }
 0x360   :  { %v724_v58 = vpop.f32.mrf.mxu0  ;;  %1917 = vmatpush3.bf16.msra.mxu1 %v2554_v53 }
 0x361   :  { %v730_v59 = vadd.f32 %v724_v58, %v685_v28  ;;  %1918 = vmatprep.subr.bf16.mxu1 %v2283_v0  ;;  %1937 = vmatpush3.bf16.msra.mxu0 %v2433_v18 }
 0x362   :  { %v1862_v60 = vpop.f32.mrf.mxu0  ;;  %1938 = vmatprep.subr.bf16.mxu0 %v2283_v0 }
 0x363   :  { %v731_v61 = vmax.f32 %v730_v59, 0.0 }
 0x364   :  { %v727_v62 = vpop.f32.mrf.mxu0  ;;  %1919 = vmatpush3.bf16.msra.mxu1 %v2561_v55 }
 0x365   :  { %v732_v63 = vpack.c.bf16 %v731_v61, %v731_v61  ;;  %1944 = vmatprep.subr.bf16.mxu1 %v2283_v0  ;;  %1939 = vmatpush3.bf16.msra.mxu0 %v2445_v20  ;;  %v2208_v62 = vld [vmem:[#allocation2 + $0x38] sm:$0xff]  }
 0x366   :  { %v1863_v1 = vpop.f32.mrf.mxu0  ;;  %1964 = vmatprep.subr.bf16.mxu0 %v2283_v0 }
 0x367   :  { %1921 = vmatmul.mubr.bf16.vlgmr.msra.gmra.mxu1 %v732_v63 }
 0x368   :  { %1945 = vmatpush3.bf16.msra.mxu1 %v2361_v5  ;;  %1960 = vmatprep.mubr.msk.bf16.mxu1 %vm2284_vm1, %v2283_v0 }
 0x369   :  { %1946 = vmatprep.subr.bf16.mxu1 %v2283_v0 }
 0x36c   :  { %1947 = vmatpush3.bf16.msra.mxu1 %v2372_v7 }
 0x36d   :  { %1948 = vmatprep.subr.bf16.mxu1 %v2283_v0 }
 0x370   :  { %1949 = vmatpush3.bf16.msra.mxu1 %v2383_v9 }
 0x371   :  { %1950 = vmatprep.subr.bf16.mxu1 %v2283_v0 }
 0x374   :  { %1951 = vmatpush3.bf16.msra.mxu1 %v2393_v11 }
 0x375   :  { %1952 = vmatprep.subr.bf16.mxu1 %v2283_v0 }
 0x378   :  { %1953 = vmatpush3.bf16.msra.mxu1 %v2403_v13 }
 0x379   :  { %1954 = vmatprep.subr.bf16.mxu1 %v2283_v0 }
 0x37c   :  { %1955 = vmatpush3.bf16.msra.mxu1 %v2414_v15 }
 0x37d   :  { %1956 = vmatprep.subr.bf16.mxu1 %v2283_v0 }
 0x380   :  { %1957 = vmatpush3.bf16.msra.mxu1 %v2435_v19 }
 0x381   :  { %1958 = vmatprep.subr.bf16.mxu1 %v2283_v0 }
 0x384   :  { %1959 = vmatpush3.bf16.msra.mxu1 %v2447_v21 }
 0x385   :  { %1984 = vmatprep.subr.bf16.mxu1 %v2283_v0 }
 0x407   :  { %v767_v3 = vpop.f32.mrf.mxu1  ;;  %v810_v16 = vpop.f32.mrf.mxu0 }
 0x408   :  { %v773_v17 = vadd.f32 %v767_v3, %v236_v2  ;;  %v811_v31 = vadd.f32 %v2550_v52, %v810_v16 }
 0x409   :  { %v1882_v24 = vpop.f32.mrf.mxu1  ;;  %v1902_v22 = vpop.f32.mrf.mxu0 }
 0x40a   :  { %v774_v25 = vmax.f32 %v773_v17, 0.0  ;;  %v2211_v22 = vld [vmem:[#allocation2 + $0x20] sm:$0xff]  }
 0x40b   :  { %v770_v26 = vpop.f32.mrf.mxu1  ;;  %v813_v27 = vpop.f32.mrf.mxu0 }
 0x40c   :  { %v775_v29 = vpack.c.bf16 %v774_v25, %v774_v25  ;;  %v2212_v25 = vld [vmem:[#allocation2 + $0x18] sm:$0xff]   ;;  %v2213_v26 = vld [vmem:[#allocation2 + $0x10] sm:$0xff]  }
 0x40d   :  { %v1883_v34 = vpop.f32.mrf.mxu1  ;;  %v1903_v35 = vpop.f32.mrf.mxu0 }
 0x40e   :  { %1941 = vmatmul.mubr.bf16.vlgmr.msra.gmra.mxu0 %v775_v29  ;;  %1961 = vmatmul.mubr.bf16.vlgmr.msra.gmra.mxu1 %v775_v29 }
 0x40f   :  { %1965 = vmatpush3.bf16.msra.mxu0 %v2512_v43  ;;  %1980 = vmatprep.mubr.msk.bf16.mxu0 %vm2284_vm1, %v2283_v0 }
 0x410   :  { %1966 = vmatprep.subr.bf16.mxu0 %v2283_v0  ;;  %1985 = vmatpush3.bf16.msra.mxu1 %v2358_v4 }
 0x411   :  { %1986 = vmatprep.subr.bf16.mxu1 %v2283_v0  ;;  %2000 = vmatprep.mubr.msk.bf16.mxu1 %vm2284_vm1, %v2283_v0 }
 0x413   :  { %1967 = vmatpush3.bf16.msra.mxu0 %v2515_v47 }
 0x414   :  { %1968 = vmatprep.subr.bf16.mxu0 %v2283_v0  ;;  %1987 = vmatpush3.bf16.msra.mxu1 %v2367_v6 }
 0x415   :  { %1988 = vmatprep.subr.bf16.mxu1 %v2283_v0 }
 0x417   :  { %1969 = vmatpush3.bf16.msra.mxu0 %v2525_v48 }
 0x418   :  { %1970 = vmatprep.subr.bf16.mxu0 %v2283_v0  ;;  %1989 = vmatpush3.bf16.msra.mxu1 %v2379_v8 }
 0x419   :  { %1990 = vmatprep.subr.bf16.mxu1 %v2283_v0 }
 0x41b   :  { %1971 = vmatpush3.bf16.msra.mxu0 %v2531_v49 }
 0x41c   :  { %1972 = vmatprep.subr.bf16.mxu0 %v2283_v0  ;;  %1991 = vmatpush3.bf16.msra.mxu1 %v2390_v10 }
 0x41d   :  { %1992 = vmatprep.subr.bf16.mxu1 %v2283_v0 }
 0x41f   :  { %1973 = vmatpush3.bf16.msra.mxu0 %v2537_v50 }
 0x420   :  { %1974 = vmatprep.subr.bf16.mxu0 %v2283_v0  ;;  %1993 = vmatpush3.bf16.msra.mxu1 %v2399_v12 }
 0x421   :  { %1994 = vmatprep.subr.bf16.mxu1 %v2283_v0 }
 0x423   :  { %1975 = vmatpush3.bf16.msra.mxu0 %v2543_v51 }
 0x424   :  { %1976 = vmatprep.subr.bf16.mxu0 %v2283_v0  ;;  %1995 = vmatpush3.bf16.msra.mxu1 %v2410_v14 }
 0x425   :  { %1996 = vmatprep.subr.bf16.mxu1 %v2283_v0 }
 0x427   :  { %v850_v36 = vpop.f32.mrf.mxu1  ;;  %1977 = vmatpush3.bf16.msra.mxu0 %v2554_v53 }
 0x428   :  { %v856_v37 = vadd.f32 %v850_v36, %v811_v31  ;;  %1978 = vmatprep.subr.bf16.mxu0 %v2283_v0  ;;  %1997 = vmatpush3.bf16.msra.mxu1 %v2433_v18 }
 0x429   :  { %v1922_v38 = vpop.f32.mrf.mxu1  ;;  %1998 = vmatprep.subr.bf16.mxu1 %v2283_v0 }
 0x42a   :  { %v857_v39 = vmax.f32 %v856_v37, 0.0 }
 0x42b   :  { %v853_v40 = vpop.f32.mrf.mxu1  ;;  %1979 = vmatpush3.bf16.msra.mxu0 %v2561_v55 }
 0x42c   :  { %v858_v41 = vpack.c.bf16 %v857_v39, %v857_v39  ;;  %2004 = vmatprep.subr.bf16.mxu0 %v2283_v0  ;;  %1999 = vmatpush3.bf16.msra.mxu1 %v2445_v20 }
 0x42d   :  { %v1923_v42 = vpop.f32.mrf.mxu1  ;;  %2024 = vmatprep.subr.bf16.mxu1 %v2283_v0 }
 0x42e   :  { %1981 = vmatmul.mubr.bf16.vlgmr.msra.gmra.mxu0 %v858_v41 }
 0x42f   :  { %2005 = vmatpush3.bf16.msra.mxu0 %v2361_v5  ;;  %2020 = vmatprep.mubr.msk.bf16.mxu0 %vm2284_vm1, %v2283_v0  ;;  %v239_v5 = vadd.f32 %v2462_v23, %v2509_v33 }
 0x430   :  { %2006 = vmatprep.subr.bf16.mxu0 %v2283_v0 }
 0x433   :  { %2007 = vmatpush3.bf16.msra.mxu0 %v2372_v7 }
 0x434   :  { %2008 = vmatprep.subr.bf16.mxu0 %v2283_v0 }
 0x437   :  { %2009 = vmatpush3.bf16.msra.mxu0 %v2383_v9 }
 0x438   :  { %2010 = vmatprep.subr.bf16.mxu0 %v2283_v0 }
 0x43b   :  { %2011 = vmatpush3.bf16.msra.mxu0 %v2393_v11 }
 0x43c   :  { %2012 = vmatprep.subr.bf16.mxu0 %v2283_v0 }
 0x43f   :  { %2013 = vmatpush3.bf16.msra.mxu0 %v2403_v13 }
 0x440   :  { %2014 = vmatprep.subr.bf16.mxu0 %v2283_v0 }
 0x443   :  { %2015 = vmatpush3.bf16.msra.mxu0 %v2414_v15 }
 0x444   :  { %2016 = vmatprep.subr.bf16.mxu0 %v2283_v0 }
 0x447   :  { %2017 = vmatpush3.bf16.msra.mxu0 %v2435_v19 }
 0x448   :  { %2018 = vmatprep.subr.bf16.mxu0 %v2283_v0 }
 0x44b   :  { %2019 = vmatpush3.bf16.msra.mxu0 %v2447_v21 }
 0x44c   :  { %2044 = vmatprep.subr.bf16.mxu0 %v2283_v0 }
 0x4ce   :  { %v893_v7 = vpop.f32.mrf.mxu0  ;;  %v936_v44 = vpop.f32.mrf.mxu1 }
 0x4cf   :  { %v899_v45 = vadd.f32 %v893_v7, %v239_v5 }
 0x4d0   :  { %v1942_v46 = vpop.f32.mrf.mxu0  ;;  %v1962_v54 = vpop.f32.mrf.mxu1 }
 0x4d1   :  { %v900_v56 = vmax.f32 %v899_v45, 0.0  ;;  %v2200_v46 = vld [vmem:[#allocation6 + $0x38] sm:$0xff]   ;;  %v2201_v54 = vld [vmem:[#allocation6 + $0x30] sm:$0xff]  }
 0x4d2   :  { %v896_v57 = vpop.f32.mrf.mxu0  ;;  %v939_v28 = vpop.f32.mrf.mxu1 }
 0x4d3   :  { %v901_v58 = vpack.c.bf16 %v900_v56, %v900_v56  ;;  %v2202_v56 = vld [vmem:[#allocation6 + $0x28] sm:$0xff]   ;;  %v2203_v57 = vld [vmem:[#allocation6 + $0x20] sm:$0xff]   ;;  %v2204_v28 = vld [vmem:[#allocation6 + $0x18] sm:$0xff]  }
 0x4d4   :  { %v1943_v59 = vpop.f32.mrf.mxu0  ;;  %v1963_v60 = vpop.f32.mrf.mxu1 }
 0x4d5   :  { %2001 = vmatmul.mubr.bf16.vlgmr.msra.gmra.mxu1 %v901_v58  ;;  %2021 = vmatmul.mubr.bf16.vlgmr.msra.gmra.mxu0 %v901_v58  ;;  %v2205_v58 = vld [vmem:[#allocation6 + $0x10] sm:$0xff]   ;;  %v2206_v59 = vld [vmem:[#allocation6 + $0x8] sm:$0xff]   ;;  %v2207_v60 = vld [vmem:[#allocation6] sm:$0xff]  }
 0x4d6   :  { %2025 = vmatpush3.bf16.msra.mxu1 %v2512_v43  ;;  %2040 = vmatprep.mubr.msk.bf16.mxu1 %vm2284_vm1, %v2283_v0 }
 0x4d7   :  { %2026 = vmatprep.subr.bf16.mxu1 %v2283_v0  ;;  %2045 = vmatpush3.bf16.msra.mxu0 %v2358_v4  ;;  %v937_v4 = vadd.f32 %v2550_v52, %v936_v44 }
 0x4d8   :  { %2046 = vmatprep.subr.bf16.mxu0 %v2283_v0  ;;  %2060 = vmatprep.mubr.msk.bf16.mxu0 %vm2284_vm1, %v2283_v0 }
 0x4da   :  { %2027 = vmatpush3.bf16.msra.mxu1 %v2515_v47 }
 0x4db   :  { %2028 = vmatprep.subr.bf16.mxu1 %v2283_v0  ;;  %2047 = vmatpush3.bf16.msra.mxu0 %v2367_v6 }
 0x4dc   :  { %2048 = vmatprep.subr.bf16.mxu0 %v2283_v0 }
 0x4de   :  { %2029 = vmatpush3.bf16.msra.mxu1 %v2525_v48 }
 0x4df   :  { %2030 = vmatprep.subr.bf16.mxu1 %v2283_v0  ;;  %2049 = vmatpush3.bf16.msra.mxu0 %v2379_v8 }
 0x4e0   :  { %2050 = vmatprep.subr.bf16.mxu0 %v2283_v0 }
 0x4e2   :  { %2031 = vmatpush3.bf16.msra.mxu1 %v2531_v49 }
 0x4e3   :  { %2032 = vmatprep.subr.bf16.mxu1 %v2283_v0  ;;  %2051 = vmatpush3.bf16.msra.mxu0 %v2390_v10 }
 0x4e4   :  { %2052 = vmatprep.subr.bf16.mxu0 %v2283_v0 }
 0x4e6   :  { %2033 = vmatpush3.bf16.msra.mxu1 %v2537_v50 }
 0x4e7   :  { %2034 = vmatprep.subr.bf16.mxu1 %v2283_v0  ;;  %2053 = vmatpush3.bf16.msra.mxu0 %v2399_v12 }
 0x4e8   :  { %2054 = vmatprep.subr.bf16.mxu0 %v2283_v0 }
 0x4ea   :  { %2035 = vmatpush3.bf16.msra.mxu1 %v2543_v51 }
 0x4eb   :  { %2036 = vmatprep.subr.bf16.mxu1 %v2283_v0  ;;  %2055 = vmatpush3.bf16.msra.mxu0 %v2410_v14 }
 0x4ec   :  { %2056 = vmatprep.subr.bf16.mxu0 %v2283_v0 }
 0x4ee   :  { %v976_v6 = vpop.f32.mrf.mxu0  ;;  %2037 = vmatpush3.bf16.msra.mxu1 %v2554_v53 }
 0x4ef   :  { %v982_v8 = vadd.f32 %v976_v6, %v937_v4  ;;  %2038 = vmatprep.subr.bf16.mxu1 %v2283_v0  ;;  %2057 = vmatpush3.bf16.msra.mxu0 %v2433_v18  ;;  %v2209_v18 = vld [vmem:[#allocation2 + $0x30] sm:$0xff]  }
 0x4f0   :  { %v1982_v10 = vpop.f32.mrf.mxu0  ;;  %2058 = vmatprep.subr.bf16.mxu0 %v2283_v0 }
 0x4f1   :  { %v983_v12 = vmax.f32 %v982_v8, 0.0 }
 0x4f2   :  { %v979_v33 = vpop.f32.mrf.mxu0  ;;  %2039 = vmatpush3.bf16.msra.mxu1 %v2561_v55 }
 0x4f3   :  { %v984_v14 = vpack.c.bf16 %v983_v12, %v983_v12  ;;  %2064 = vmatprep.subr.bf16.mxu1 %v2283_v0  ;;  %2059 = vmatpush3.bf16.msra.mxu0 %v2445_v20 }
 0x4f4   :  { %v1983_v61 = vpop.f32.mrf.mxu0  ;;  %2084 = vmatprep.subr.bf16.mxu0 %v2283_v0 }
 0x4f5   :  { %2041 = vmatmul.mubr.bf16.vlgmr.msra.gmra.mxu1 %v984_v14 }
 0x4f6   :  { %2065 = vmatpush3.bf16.msra.mxu1 %v2208_v62  ;;  %2080 = vmatprep.mubr.msk.bf16.mxu1 %vm2284_vm1, %v2283_v0 }
 0x4f7   :  { %2066 = vmatprep.subr.bf16.mxu1 %v2283_v0 }
 0x4fa   :  { %2067 = vmatpush3.bf16.msra.mxu1 %v2209_v18 }
 0x4fb   :  { %2068 = vmatprep.subr.bf16.mxu1 %v2283_v0 }
 0x4fe   :  { %2069 = vmatpush3.bf16.msra.mxu1 %v2383_v9  ;;  %v244_v9 = vadd.f32 %v2503_v30, %v2462_v23  ;;  %v2210_v30 = vld [vmem:[#allocation2 + $0x28] sm:$0xff]  }
 0x4ff   :  { %2070 = vmatprep.subr.bf16.mxu1 %v2283_v0 }
 0x502   :  { %2071 = vmatpush3.bf16.msra.mxu1 %v2393_v11 }
 0x503   :  { %2072 = vmatprep.subr.bf16.mxu1 %v2283_v0 }
 0x506   :  { %2073 = vmatpush3.bf16.msra.mxu1 %v2403_v13 }
 0x507   :  { %2074 = vmatprep.subr.bf16.mxu1 %v2283_v0 }
 0x50a   :  { %2075 = vmatpush3.bf16.msra.mxu1 %v2414_v15 }
 0x50b   :  { %2076 = vmatprep.subr.bf16.mxu1 %v2283_v0 }
 0x50e   :  { %2077 = vmatpush3.bf16.msra.mxu1 %v2435_v19 }
 0x50f   :  { %2078 = vmatprep.subr.bf16.mxu1 %v2283_v0 }
 0x512   :  { %2079 = vmatpush3.bf16.msra.mxu1 %v2447_v21 }
 0x513   :  { %2104 = vmatprep.subr.bf16.mxu1 %v2283_v0 }
 0x595   :  { %v1019_v11 = vpop.f32.mrf.mxu1  ;;  %v1062_v20 = vpop.f32.mrf.mxu0 }
 0x596   :  { %v1025_v13 = vadd.f32 %v1019_v11, %v244_v9  ;;  %v1063_v27 = vadd.f32 %v2550_v52, %v1062_v20 }
 0x597   :  { %v2002_v63 = vpop.f32.mrf.mxu1  ;;  %v2022_v1 = vpop.f32.mrf.mxu0 }
 0x598   :  { %v1026_v2 = vmax.f32 %v1025_v13, 0.0 }
 0x599   :  { %v1022_v15 = vpop.f32.mrf.mxu1  ;;  %v1065_v3 = vpop.f32.mrf.mxu0 }
 0x59a   :  { %v1027_v16 = vpack.c.bf16 %v1026_v2, %v1026_v2 }
 0x59b   :  { %v2003_v17 = vpop.f32.mrf.mxu1  ;;  %v2023_v24 = vpop.f32.mrf.mxu0 }
 0x59c   :  { %2061 = vmatmul.mubr.bf16.vlgmr.msra.gmra.mxu0 %v1027_v16  ;;  %2081 = vmatmul.mubr.bf16.vlgmr.msra.gmra.mxu1 %v1027_v16 }
 0x59d   :  { %2085 = vmatpush3.bf16.msra.mxu0 %v2512_v43  ;;  %2100 = vmatprep.mubr.msk.bf16.mxu0 %vm2284_vm1, %v2283_v0 }
 0x59e   :  { %2086 = vmatprep.subr.bf16.mxu0 %v2283_v0  ;;  %2105 = vmatpush3.bf16.msra.mxu1 %v2208_v62 }
 0x59f   :  { %2106 = vmatprep.subr.bf16.mxu1 %v2283_v0  ;;  %2120 = vmatprep.mubr.msk.bf16.mxu1 %vm2284_vm1, %v2283_v0 }
 0x5a1   :  { %2087 = vmatpush3.bf16.msra.mxu0 %v2515_v47 }
 0x5a2   :  { %2088 = vmatprep.subr.bf16.mxu0 %v2283_v0  ;;  %2107 = vmatpush3.bf16.msra.mxu1 %v2209_v18 }
 0x5a3   :  { %2108 = vmatprep.subr.bf16.mxu1 %v2283_v0 }
 0x5a5   :  { %2089 = vmatpush3.bf16.msra.mxu0 %v2525_v48 }
 0x5a6   :  { %2090 = vmatprep.subr.bf16.mxu0 %v2283_v0  ;;  %2109 = vmatpush3.bf16.msra.mxu1 %v2210_v30 }
 0x5a7   :  { %2110 = vmatprep.subr.bf16.mxu1 %v2283_v0 }
 0x5a9   :  { %2091 = vmatpush3.bf16.msra.mxu0 %v2531_v49 }
 0x5aa   :  { %2092 = vmatprep.subr.bf16.mxu0 %v2283_v0  ;;  %2111 = vmatpush3.bf16.msra.mxu1 %v2211_v22 }
 0x5ab   :  { %2112 = vmatprep.subr.bf16.mxu1 %v2283_v0 }
 0x5ad   :  { %2093 = vmatpush3.bf16.msra.mxu0 %v2537_v50 }
 0x5ae   :  { %2094 = vmatprep.subr.bf16.mxu0 %v2283_v0  ;;  %2113 = vmatpush3.bf16.msra.mxu1 %v2212_v25 }
 0x5af   :  { %2114 = vmatprep.subr.bf16.mxu1 %v2283_v0 }
 0x5b1   :  { %2095 = vmatpush3.bf16.msra.mxu0 %v2543_v51 }
 0x5b2   :  { %2096 = vmatprep.subr.bf16.mxu0 %v2283_v0  ;;  %2115 = vmatpush3.bf16.msra.mxu1 %v2213_v26 }
 0x5b3   :  { %2116 = vmatprep.subr.bf16.mxu1 %v2283_v0 }
 0x5b5   :  { %v1102_v29 = vpop.f32.mrf.mxu1  ;;  %2097 = vmatpush3.bf16.msra.mxu0 %v2554_v53 }
 0x5b6   :  { %v1108_v34 = vadd.f32 %v1102_v29, %v1063_v27  ;;  %2098 = vmatprep.subr.bf16.mxu0 %v2283_v0  ;;  %2117 = vmatpush3.bf16.msra.mxu1 %v2435_v19  ;;  %v247_v19 = vadd.f32 %v2507_v32, %v2462_v23 }
 0x5b7   :  { %v2042_v35 = vpop.f32.mrf.mxu1  ;;  %2118 = vmatprep.subr.bf16.mxu1 %v2283_v0 }
 0x5b8   :  { %v1109_v31 = vmax.f32 %v1108_v34, 0.0 }
 0x5b9   :  { %v1105_v36 = vpop.f32.mrf.mxu1  ;;  %2099 = vmatpush3.bf16.msra.mxu0 %v2561_v55 }
 0x5ba   :  { %v1110_v37 = vpack.c.bf16 %v1109_v31, %v1109_v31  ;;  %2119 = vmatpush3.bf16.msra.mxu1 %v2447_v21  ;;  %2124 = vmatprep.subr.bf16.mxu0 %v2283_v0 }
 0x5bb   :  { %v2043_v38 = vpop.f32.mrf.mxu1  ;;  %2144 = vmatprep.subr.bf16.mxu1 %v2283_v0 }
 0x5bc   :  { %2101 = vmatmul.mubr.bf16.vlgmr.msra.gmra.mxu0 %v1110_v37 }
 0x5bd   :  { %2125 = vmatpush3.bf16.msra.mxu0 %v2512_v43  ;;  %2140 = vmatprep.mubr.msk.bf16.mxu0 %vm2284_vm1, %v2283_v0 }
 0x5be   :  { %2126 = vmatprep.subr.bf16.mxu0 %v2283_v0 }
 0x5c1   :  { %2127 = vmatpush3.bf16.msra.mxu0 %v2515_v47 }
 0x5c2   :  { %2128 = vmatprep.subr.bf16.mxu0 %v2283_v0 }
 0x5c5   :  { %2129 = vmatpush3.bf16.msra.mxu0 %v2525_v48 }
 0x5c6   :  { %2130 = vmatprep.subr.bf16.mxu0 %v2283_v0 }
 0x5c9   :  { %2131 = vmatpush3.bf16.msra.mxu0 %v2531_v49 }
 0x5ca   :  { %2132 = vmatprep.subr.bf16.mxu0 %v2283_v0 }
 0x5cd   :  { %2133 = vmatpush3.bf16.msra.mxu0 %v2537_v50 }
 0x5ce   :  { %2134 = vmatprep.subr.bf16.mxu0 %v2283_v0 }
 0x5d1   :  { %2135 = vmatpush3.bf16.msra.mxu0 %v2543_v51 }
 0x5d2   :  { %2136 = vmatprep.subr.bf16.mxu0 %v2283_v0 }
 0x5d5   :  { %2137 = vmatpush3.bf16.msra.mxu0 %v2554_v53 }
 0x5d6   :  { %2138 = vmatprep.subr.bf16.mxu0 %v2283_v0 }
 0x5d9   :  { %2139 = vmatpush3.bf16.msra.mxu0 %v2561_v55 }
 0x65c   :  { %v1145_v21 = vpop.f32.mrf.mxu0  ;;  %v1188_v43 = vpop.f32.mrf.mxu1 }
 0x65d   :  { %v1151_v47 = vadd.f32 %v1145_v21, %v247_v19  ;;  %v1189_v53 = vadd.f32 %v2550_v52, %v1188_v43 }
 0x65e   :  { %v2062_v48 = vpop.f32.mrf.mxu0  ;;  %v2082_v49 = vpop.f32.mrf.mxu1 }
 0x65f   :  { %v1152_v50 = vmax.f32 %v1151_v47, 0.0 }
 0x660   :  { %v1148_v39 = vpop.f32.mrf.mxu0  ;;  %v1191_v40 = vpop.f32.mrf.mxu1 }
 0x661   :  { %v1153_v51 = vpack.c.bf16 %v1152_v50, %v1152_v50 }
 0x662   :  { %v2063_v41 = vpop.f32.mrf.mxu0  ;;  %v2083_v42 = vpop.f32.mrf.mxu1 }
 0x663   :  { %2121 = vmatmul.mubr.bf16.vlgmr.msra.gmra.mxu1 %v1153_v51 }
 0x664   :  { %2160 = vmatprep.mubr.msk.bf16.mxu1 %vm2284_vm1, %v2283_v0  ;;  %2145 = vmatpush3.bf16.msra.mxu1 %v2200_v46 }
 0x665   :  { %2146 = vmatprep.subr.bf16.mxu1 %v2283_v0 }
 0x668   :  { %2147 = vmatpush3.bf16.msra.mxu1 %v2201_v54 }
 0x669   :  { %2148 = vmatprep.subr.bf16.mxu1 %v2283_v0 }
 0x66c   :  { %2149 = vmatpush3.bf16.msra.mxu1 %v2202_v56 }
 0x66d   :  { %2150 = vmatprep.subr.bf16.mxu1 %v2283_v0 }
 0x670   :  { %2151 = vmatpush3.bf16.msra.mxu1 %v2203_v57 }
 0x671   :  { %2152 = vmatprep.subr.bf16.mxu1 %v2283_v0 }
 0x674   :  { %2153 = vmatpush3.bf16.msra.mxu1 %v2204_v28 }
 0x675   :  { %2154 = vmatprep.subr.bf16.mxu1 %v2283_v0 }
 0x678   :  { %2155 = vmatpush3.bf16.msra.mxu1 %v2205_v58 }
 0x679   :  { %2156 = vmatprep.subr.bf16.mxu1 %v2283_v0 }
 0x67c   :  { %v1228_v55 = vpop.f32.mrf.mxu0  ;;  %2157 = vmatpush3.bf16.msra.mxu1 %v2206_v59 }
 0x67d   :  { %v1234_v5 = vadd.f32 %v1228_v55, %v1189_v53  ;;  %2158 = vmatprep.subr.bf16.mxu1 %v2283_v0  ;;  %v1473_v0 = vld [vmem:[%s2891_s8] ss:$0 sm:$0xff] }
 0x67e   :  { %v2102_v23 = vpop.f32.mrf.mxu0 }
 0x67f   :  { %v1235_v32 = vmax.f32 %v1234_v5, 0.0 }
 0x680   :  { %v1231_v7 = vpop.f32.mrf.mxu0  ;;  %2159 = vmatpush3.bf16.msra.mxu1 %v2207_v60 }
 0x681   :  { %v1236_v44 = vpack.c.bf16 %v1235_v32, %v1235_v32 }
 0x682   :  { %v2103_v45 = vpop.f32.mrf.mxu0 }
 0x683   :  { %2141 = vmatmul.mubr.bf16.vlgmr.msra.gmra.mxu0 %v1236_v44 }
 0x723   :  { %v1271_v4 = vpop.f32.mrf.mxu1 }
 0x724   :  { %v1272_v12 = vadd.f32 %v2550_v52, %v1271_v4 }
 0x725   :  { %v2122_v6 = vpop.f32.mrf.mxu1 }
 0x727   :  { %v1274_v8 = vpop.f32.mrf.mxu1 }
 0x729   :  { %v2123_v10 = vpop.f32.mrf.mxu1 }
 0x743   :  { %v1311_v33 = vpop.f32.mrf.mxu0 }
 0x744   :  { %v1317_v14 = vadd.f32 %v1311_v33, %v1272_v12 }
 0x745   :  { %v2142_v61 = vpop.f32.mrf.mxu0 }
 0x746   :  { %v1318_v62 = vmax.f32 %v1317_v14, 0.0 }
 0x747   :  { %v1314_v18 = vpop.f32.mrf.mxu0 }
 0x748   :  { %v1319_v9 = vpack.c.bf16 %v1318_v62, %v1318_v62 }
 0x749   :  { %v2143_v11 = vpop.f32.mrf.mxu0 }
 0x74a   :  { %2161 = vmatmul.mubr.bf16.vlgmr.msra.gmra.mxu1 %v1319_v9 }
 0x80a   :  { %v1425_v20 = vpop.f32.mrf.mxu1 }
 0x80b   :  { %v1426_v13 = vadd.f32 %v1473_v0, %v1425_v20 }
 0x80c   :  { %v2162_v63 = vpop.f32.mrf.mxu1 }
 0x80d   :  { %1431 = vst [vmem:[%s2892_s9] sm:$0xff] %v1426_v13 }
 0x80e   :  { %v1428_v52 = vpop.f32.mrf.mxu1 }
 0x810   :  { %v2163_v1 = vpop.f32.mrf.mxu1 }
 0x811   :  { %1436 = vsyncpa [#allocation3], 1 }
 0x812   :  { %1437 = vsyncpa [#allocation5], 1 }

</bundles_post_ra>
